<compile_context>
chip_gen: v7x
topology: tpu7x:2x2x1
jax: 0.10.0
libtpu: 0.0.40
codegen_flags: <defaults>
</compile_context>

<pallas_src>
import functools
import math

import jax
import jax.numpy as jnp
from jax import lax
from jax.experimental import pallas as pl
from jax.experimental.pallas import tpu as pltpu

SCALE = 1.0 / math.sqrt(10.0)  # torch code divides by np.sqrt(10) (fixed, not d_k)


def _flash_sdpa_kernel(q_ref, k_ref, v_ref, o_ref, m_ref, l_ref, acc_ref,
                       *, kv_len, tk, mask_kv):
    """One (tq, D) query tile x one (tk, D) key/value tile, online softmax."""
    ki = pl.program_id(2)

    @pl.when(ki == 0)
    def _init():
        m_ref[...] = jnp.full_like(m_ref, -jnp.inf)
        l_ref[...] = jnp.zeros_like(l_ref)
        acc_ref[...] = jnp.zeros_like(acc_ref)

    # Fold the fixed 1/sqrt(10) scale into the (tq, D) Q tile: O(tq*D) work
    # instead of O(tq*tk) on the score matrix.  Native (bf16) dtype feeds MXU.
    q = q_ref[...] * SCALE

    # scores = Q @ K^T as a contraction over D (no explicit k.T / XLU transpose).
    s = lax.dot_general(
        q, k_ref[...],
        (((1,), (1,)), ((), ())),
        preferred_element_type=jnp.float32,
    )  # (tq, tk) f32

    if mask_kv:
        # Keys beyond the true sequence length are padding -> mask them out.
        # kv_len / tk are Python ints (static), so this folds to constants +
        # one iota/compare/select per step and is only emitted when needed.
        col = ki * tk + lax.broadcasted_iota(jnp.int32, s.shape, 1)
        s = jnp.where(col < kv_len, s, jnp.float32(-1e30))

    m_prev = m_ref[...]
    m_new = jnp.maximum(m_prev, jnp.max(s, axis=-1, keepdims=True))
    alpha = jnp.exp(m_prev - m_new)          # rescale factor for old state
    p = jnp.exp(s - m_new)                   # (tq, tk) f32 softmax numerators

    l_ref[...] = alpha * l_ref[...] + jnp.sum(p, axis=-1, keepdims=True)
    # P cast to V's (bf16) dtype so the PV matmul is bf16 x bf16 -> f32 acc.
    acc_ref[...] = alpha * acc_ref[...] + jnp.dot(
        p.astype(v_ref.dtype), v_ref[...],
        preferred_element_type=jnp.float32,
    )
    m_ref[...] = m_new

    @pl.when(ki == pl.num_programs(2) - 1)
    def _finalize():
        # Normalize once on the (tq, D) accumulator; approx=True routes the
        # reciprocal to the (otherwise idle) EUP slot.
        inv_l = pl.reciprocal(l_ref[...], approx=True)
        o_ref[...] = (acc_ref[...] * inv_l).astype(o_ref.dtype)


def _round_up(x, m):
    return ((x + m - 1) // m) * m


def scaled_dot_product_attention(Q, K, V):
    """Pallas TPU implementation of ScaledDotProductAttention.forward.

    Q, K, V: [B, H, S, D] arrays (same dtype). Returns context [B, H, S, D].
    """
    B, H, S, D = Q.shape
    assert K.shape == (B, H, S, D) and V.shape == (B, H, S, D)

    orig_dtype = Q.dtype
    # Feed the bf16-native MXU with bf16 operands (and halve K/V HBM bytes);
    # softmax state / accumulation stay f32 inside the kernel.
    compute_dtype = (jnp.bfloat16 if jnp.issubdtype(orig_dtype, jnp.floating)
                     else orig_dtype)

    BH = B * H
    q3 = Q.reshape(BH, S, D).astype(compute_dtype)
    k3 = K.reshape(BH, S, D).astype(compute_dtype)
    v3 = V.reshape(BH, S, D).astype(compute_dtype)

    # --- tile selection -----------------------------------------------------
    # tq: big (DMA amortization lever); tk: just enough to fill the MXU N dim.
    # Both rounded to sublane (8) granularity; never fall back to full S for
    # large irregular sequences -- pad + mask instead.
    tq_cap = 1024 if D <= 64 else 512
    tq = min(tq_cap, _round_up(S, 8))
    tk = min(256, _round_up(S, 8))

    s_q = _round_up(S, tq)   # padded query length
    s_k = _round_up(S, tk)   # padded key/value length
    if s_q != S:
        q3 = jnp.pad(q3, ((0, 0), (0, s_q - S), (0, 0)))
    if s_k != S:
        k3 = jnp.pad(k3, ((0, 0), (0, s_k - S), (0, 0)))
        v3 = jnp.pad(v3, ((0, 0), (0, s_k - S), (0, 0)))

    grid = (BH, s_q // tq, s_k // tk)  # KV reduction axis last

    q_spec = pl.BlockSpec((None, tq, D), lambda b, qi, ki: (b, qi, 0))
    kv_spec = pl.BlockSpec((None, tk, D), lambda b, qi, ki: (b, ki, 0))
    o_spec = pl.BlockSpec((None, tq, D), lambda b, qi, ki: (b, qi, 0))

    kernel = functools.partial(
        _flash_sdpa_kernel, kv_len=S, tk=tk, mask_kv=(s_k != S))

    out3 = pl.pallas_call(
        kernel,
        out_shape=jax.ShapeDtypeStruct((BH, s_q, D), orig_dtype),
        grid_spec=pltpu.PrefetchScalarGridSpec(
            num_scalar_prefetch=0,
            grid=grid,
            in_specs=[q_spec, kv_spec, kv_spec],
            out_specs=o_spec,
            scratch_shapes=[
                pltpu.VMEM((tq, 1), jnp.float32),   # running max   m
                pltpu.VMEM((tq, 1), jnp.float32),   # running denom l
                pltpu.VMEM((tq, D), jnp.float32),   # unnormalized context
            ],
        ),
        compiler_params=pltpu.CompilerParams(
            # (BH, query-tile) axes are independent -> megacore-shardable on
            # v7x; the KV axis carries the online-softmax state -> arbitrary.
            dimension_semantics=("parallel", "parallel", "arbitrary"),
        ),
    )(q3, k3, v3)

    out3 = out3[:, :S, :]
    return out3.reshape(B, H, S, D)


def _reference(Q, K, V):
    Qf, Kf, Vf = (x.astype(jnp.float32) for x in (Q, K, V))
    scores = jnp.matmul(Qf, jnp.swapaxes(Kf, -1, -2)) * SCALE
    attn = jax.nn.softmax(scores, axis=-1)
    return jnp.matmul(attn, Vf)


if __name__ == "__main__":
    # Case 1: toy shapes implied by the module (f32), single tile per axis.
    B, H, S, D = 2, 2, 8, 16
    kq, kk, kv = jax.random.split(jax.random.PRNGKey(0), 3)
    Q = jax.random.normal(kq, (B, H, S, D), dtype=jnp.float32)
    K = jax.random.normal(kk, (B, H, S, D), dtype=jnp.float32)
    V = jax.random.normal(kv, (B, H, S, D), dtype=jnp.float32)

    ctx = scaled_dot_product_attention(Q, K, V)
    jax.block_until_ready(ctx)
    ref = _reference(Q, K, V)
    assert ctx.shape == (B, H, S, D)
    assert jnp.max(jnp.abs(ctx - ref)) < 2e-2, "f32 (toy) mismatch"

    # Case 2: longer sequence -> multiple query tiles and KV steps
    # (grid = (2, 2, 8) with tq=1024, tk=256), f32 inputs fed to the MXU as
    # bf16, so tolerances are relaxed per the perf review.
    B2, H2, S2, D2 = 1, 2, 2048, 64
    kq2, kk2, kv2 = jax.random.split(jax.random.PRNGKey(1), 3)
    Q2 = jax.random.normal(kq2, (B2, H2, S2, D2), dtype=jnp.float32)
    K2 = jax.random.normal(kk2, (B2, H2, S2, D2), dtype=jnp.float32)
    V2 = jax.random.normal(kv2, (B2, H2, S2, D2), dtype=jnp.float32)
    ctx2 = scaled_dot_product_attention(Q2, K2, V2)
    jax.block_until_ready(ctx2)
    ref2 = _reference(Q2, K2, V2)
    rel_l2 = jnp.linalg.norm(ctx2 - ref2) / jnp.linalg.norm(ref2)
    assert rel_l2 < 5e-2, "f32 (tiled) relative error too large"
    assert jnp.max(jnp.abs(ctx2 - ref2)) < 1.5e-1, "f32 (tiled) outlier mismatch"

    # Case 3: bf16 inputs fed straight to the MXU (f32 softmax state).
    Q3, K3, V3 = (x.astype(jnp.bfloat16) for x in (Q2, K2, V2))
    ctx3 = scaled_dot_product_attention(Q3, K3, V3)
    jax.block_until_ready(ctx3)
    ref3 = _reference(Q3, K3, V3)
    assert jnp.max(jnp.abs(ctx3.astype(jnp.float32) - ref3)) < 5e-2, "bf16 mismatch"

    # Case 4: irregular S (not a multiple of 8/128/256) -> exercises the
    # pad + in-kernel KV masking path that replaced the full-S tile fallback.
    B4, H4, S4, D4 = 1, 1, 300, 32
    kq4, kk4, kv4 = jax.random.split(jax.random.PRNGKey(2), 3)
    Q4 = jax.random.normal(kq4, (B4, H4, S4, D4), dtype=jnp.float32)
    K4 = jax.random.normal(kk4, (B4, H4, S4, D4), dtype=jnp.float32)
    V4 = jax.random.normal(kv4, (B4, H4, S4, D4), dtype=jnp.float32)
    ctx4 = scaled_dot_product_attention(Q4, K4, V4)
    jax.block_until_ready(ctx4)
    ref4 = _reference(Q4, K4, V4)
    assert ctx4.shape == (B4, H4, S4, D4)
    assert jnp.max(jnp.abs(ctx4 - ref4)) < 5e-2, "ragged-S mismatch"

    print("KERNEL_OK")
</pallas_src>

<mosaic_0001>
module attributes {stable_mosaic.version = 11 : i64} {
  func.func @_flash_sdpa_kernel(%arg0: i32, %arg1: i32, %arg2: i32, %arg3: memref<1x8x16xbf16, #tpu.memory_space<vmem>>, %arg4: memref<1x8x16xbf16, #tpu.memory_space<vmem>>, %arg5: memref<1x8x16xbf16, #tpu.memory_space<vmem>>, %arg6: memref<1x8x16xf32, #tpu.memory_space<vmem>>, %arg7: memref<8x1xf32, #tpu.memory_space<vmem>>, %arg8: memref<8x1xf32, #tpu.memory_space<vmem>>, %arg9: memref<8x16xf32, #tpu.memory_space<vmem>>) attributes {dimension_semantics = [#tpu.dimension_semantics<parallel>, #tpu.dimension_semantics<parallel>, #tpu.dimension_semantics<arbitrary>], iteration_bounds = array<i64: 4, 1, 1>, scalar_prefetch = 0 : i64, scratch_operands = 3 : i64, tpu.core_type = #tpu.core_type<tc>, window_params = [{transform_indices = @transform_0, window_bounds = array<i64: 1, 8, 16>}, {transform_indices = @transform_1, window_bounds = array<i64: 1, 8, 16>}, {transform_indices = @transform_2, window_bounds = array<i64: 1, 8, 16>}, {transform_indices = @transform_3, window_bounds = array<i64: 1, 8, 16>}]} {
    %c0_i32 = arith.constant 0 : i32
    %0 = arith.cmpi eq, %arg2, %c0_i32 : i32
    %1 = arith.extui %0 : i1 to i32
    %c0_i32_0 = arith.constant 0 : i32
    %2 = arith.cmpi ne, %1, %c0_i32_0 : i32
    scf.if %2 {
      %cst_27 = arith.constant 0xFF800000 : f32
      %38 = vector.broadcast %cst_27 : f32 to vector<8x1xf32>
      %c0_28 = arith.constant 0 : index
      %c0_29 = arith.constant 0 : index
      %39 = vector.load %arg7[%c0_28, %c0_29] : memref<8x1xf32, #tpu.memory_space<vmem>>, vector<8x1xf32>
      tpu.vector_store %arg7[%c0_28, %c0_29], %38 {strides = array<i32>} : memref<8x1xf32, #tpu.memory_space<vmem>>, vector<8x1xf32>,
      %cst_30 = arith.constant 0.000000e+00 : f32
      %40 = vector.broadcast %cst_30 : f32 to vector<8x1xf32>
      %c0_31 = arith.constant 0 : index
      %c0_32 = arith.constant 0 : index
      %41 = vector.load %arg8[%c0_31, %c0_32] : memref<8x1xf32, #tpu.memory_space<vmem>>, vector<8x1xf32>
      tpu.vector_store %arg8[%c0_31, %c0_32], %40 {strides = array<i32>} : memref<8x1xf32, #tpu.memory_space<vmem>>, vector<8x1xf32>,
      %cst_33 = arith.constant 0.000000e+00 : f32
      %42 = vector.broadcast %cst_33 : f32 to vector<8x16xf32>
      %c0_34 = arith.constant 0 : index
      %c0_35 = arith.constant 0 : index
      %43 = vector.load %arg9[%c0_34, %c0_35] : memref<8x16xf32, #tpu.memory_space<vmem>>, vector<8x16xf32>
      tpu.vector_store %arg9[%c0_34, %c0_35], %42 {strides = array<i32>} : memref<8x16xf32, #tpu.memory_space<vmem>>, vector<8x16xf32>,
    } else {
    }
    %c0 = arith.constant 0 : index
    %c0_1 = arith.constant 0 : index
    %c0_2 = arith.constant 0 : index
    %3 = vector.load %arg3[%c0, %c0_1, %c0_2] : memref<1x8x16xbf16, #tpu.memory_space<vmem>>, vector<1x8x16xbf16>
    %4 = vector.shape_cast %3 : vector<1x8x16xbf16> to vector<8x16xbf16>
    %cst = arith.constant 3.164060e-01 : bf16
    %5 = vector.broadcast %cst : bf16 to vector<8x16xbf16>
    %6 = arith.mulf %4, %5 : vector<8x16xbf16>
    %c0_3 = arith.constant 0 : index
    %c0_4 = arith.constant 0 : index
    %c0_5 = arith.constant 0 : index
    %7 = vector.load %arg4[%c0_3, %c0_4, %c0_5] : memref<1x8x16xbf16, #tpu.memory_space<vmem>>, vector<1x8x16xbf16>
    %8 = vector.shape_cast %7 : vector<1x8x16xbf16> to vector<8x16xbf16>
    %cst_6 = arith.constant dense<0.000000e+00> : vector<8x8xf32>
    %9 = tpu.matmul %6, %8, %cst_6 {dimension_numbers = #tpu.dot_dimension_numbers<[1], [1], [0], [0], [0, 0, 1, 0], [], []>} : vector<8x16xbf16>, vector<8x16xbf16>, vector<8x8xf32> -> vector<8x8xf32>
    %c0_7 = arith.constant 0 : index
    %c0_8 = arith.constant 0 : index
    %10 = vector.load %arg7[%c0_7, %c0_8] : memref<8x1xf32, #tpu.memory_space<vmem>>, vector<8x1xf32>
    %cst_9 = arith.constant dense<0xFF800000> : vector<8xf32>
    %11 = vector.multi_reduction <maximumf>, %9, %cst_9 [1] : vector<8x8xf32> to vector<8xf32>
    %12 = vector.shape_cast %11 : vector<8xf32> to vector<8x1xf32>
    %13 = arith.maximumf %10, %12 : vector<8x1xf32>
    %14 = arith.subf %10, %13 : vector<8x1xf32>
    %15 = math.exp %14 : vector<8x1xf32>
    %16 = vector.broadcast %13 : vector<8x1xf32> to vector<8x8xf32>
    %17 = arith.subf %9, %16 : vector<8x8xf32>
    %18 = math.exp %17 : vector<8x8xf32>
    %c0_10 = arith.constant 0 : index
    %c0_11 = arith.constant 0 : index
    %19 = vector.load %arg8[%c0_10, %c0_11] : memref<8x1xf32, #tpu.memory_space<vmem>>, vector<8x1xf32>
    %20 = arith.mulf %15, %19 : vector<8x1xf32>
    %cst_12 = arith.constant dense<0.000000e+00> : vector<8xf32>
    %21 = vector.multi_reduction <add>, %18, %cst_12 [1] : vector<8x8xf32> to vector<8xf32>
    %22 = vector.shape_cast %21 : vector<8xf32> to vector<8x1xf32>
    %23 = arith.addf %20, %22 : vector<8x1xf32>
    %c0_13 = arith.constant 0 : index
    %c0_14 = arith.constant 0 : index
    %24 = vector.load %arg8[%c0_13, %c0_14] : memref<8x1xf32, #tpu.memory_space<vmem>>, vector<8x1xf32>
    tpu.vector_store %arg8[%c0_13, %c0_14], %23 {strides = array<i32>} : memref<8x1xf32, #tpu.memory_space<vmem>>, vector<8x1xf32>,
    %c0_15 = arith.constant 0 : index
    %c0_16 = arith.constant 0 : index
    %25 = vector.load %arg9[%c0_15, %c0_16] : memref<8x16xf32, #tpu.memory_space<vmem>>, vector<8x16xf32>
    %26 = vector.broadcast %15 : vector<8x1xf32> to vector<8x16xf32>
    %27 = arith.mulf %26, %25 : vector<8x16xf32>
    %28 = arith.truncf %18 : vector<8x8xf32> to vector<8x8xbf16>
    %c0_17 = arith.constant 0 : index
    %c0_18 = arith.constant 0 : index
    %c0_19 = arith.constant 0 : index
    %29 = vector.load %arg5[%c0_17, %c0_18, %c0_19] : memref<1x8x16xbf16, #tpu.memory_space<vmem>>, vector<1x8x16xbf16>
    %30 = vector.shape_cast %29 : vector<1x8x16xbf16> to vector<8x16xbf16>
    %cst_20 = arith.constant dense<0.000000e+00> : vector<8x16xf32>
    %31 = tpu.matmul %28, %30, %cst_20 {dimension_numbers = #tpu.dot_dimension_numbers<[1], [0], [0], [1], [0, 0, 1, 1], [], []>} : vector<8x8xbf16>, vector<8x16xbf16>, vector<8x16xf32> -> vector<8x16xf32>
    %32 = arith.addf %27, %31 : vector<8x16xf32>
    %c0_21 = arith.constant 0 : index
    %c0_22 = arith.constant 0 : index
    %33 = vector.load %arg9[%c0_21, %c0_22] : memref<8x16xf32, #tpu.memory_space<vmem>>, vector<8x16xf32>
    tpu.vector_store %arg9[%c0_21, %c0_22], %32 {strides = array<i32>} : memref<8x16xf32, #tpu.memory_space<vmem>>, vector<8x16xf32>,
    %c0_23 = arith.constant 0 : index
    %c0_24 = arith.constant 0 : index
    %34 = vector.load %arg7[%c0_23, %c0_24] : memref<8x1xf32, #tpu.memory_space<vmem>>, vector<8x1xf32>
    tpu.vector_store %arg7[%c0_23, %c0_24], %13 {strides = array<i32>} : memref<8x1xf32, #tpu.memory_space<vmem>>, vector<8x1xf32>,
    %c0_i32_25 = arith.constant 0 : i32
    %35 = arith.cmpi eq, %arg2, %c0_i32_25 : i32
    %36 = arith.extui %35 : i1 to i32
    %c0_i32_26 = arith.constant 0 : i32
    %37 = arith.cmpi ne, %36, %c0_i32_26 : i32
    scf.if %37 {
      %c0_27 = arith.constant 0 : index
      %c0_28 = arith.constant 0 : index
      %38 = vector.load %arg8[%c0_27, %c0_28] : memref<8x1xf32, #tpu.memory_space<vmem>>, vector<8x1xf32>
      %39 = tpu.reciprocal %38 {approx = true} : vector<8x1xf32> -> vector<8x1xf32>
      %c0_29 = arith.constant 0 : index
      %c0_30 = arith.constant 0 : index
      %40 = vector.load %arg9[%c0_29, %c0_30] : memref<8x16xf32, #tpu.memory_space<vmem>>, vector<8x16xf32>
      %41 = vector.broadcast %39 : vector<8x1xf32> to vector<8x16xf32>
      %42 = arith.mulf %40, %41 : vector<8x16xf32>
      %c0_31 = arith.constant 0 : index
      %c0_32 = arith.constant 0 : index
      %c0_33 = arith.constant 0 : index
      %43 = vector.load %arg6[%c0_31, %c0_32, %c0_33] : memref<1x8x16xf32, #tpu.memory_space<vmem>>, vector<1x8x16xf32>
      %44 = vector.shape_cast %43 : vector<1x8x16xf32> to vector<8x16xf32>
      %45 = vector.shape_cast %42 : vector<8x16xf32> to vector<1x8x16xf32>
      tpu.vector_store %arg6[%c0_31, %c0_32, %c0_33], %45 {strides = array<i32>} : memref<1x8x16xf32, #tpu.memory_space<vmem>>, vector<1x8x16xf32>,
    } else {
    }
    return
  }
  func.func @transform_0(%arg0: i32, %arg1: i32, %arg2: i32) -> (i32, i32, i32) {
    %c0_i32 = arith.constant 0 : i32
    %c0_i32_0 = arith.constant 0 : i32
    return %arg0, %arg1, %c0_i32 : i32, i32, i32
  }
  func.func @transform_1(%arg0: i32, %arg1: i32, %arg2: i32) -> (i32, i32, i32) {
    %c0_i32 = arith.constant 0 : i32
    %c0_i32_0 = arith.constant 0 : i32
    return %arg0, %arg2, %c0_i32 : i32, i32, i32
  }
  func.func @transform_2(%arg0: i32, %arg1: i32, %arg2: i32) -> (i32, i32, i32) {
    %c0_i32 = arith.constant 0 : i32
    %c0_i32_0 = arith.constant 0 : i32
    return %arg0, %arg2, %c0_i32 : i32, i32, i32
  }
  func.func @transform_3(%arg0: i32, %arg1: i32, %arg2: i32) -> (i32, i32, i32) {
    %c0_i32 = arith.constant 0 : i32
    %c0_i32_0 = arith.constant 0 : i32
    return %arg0, %arg1, %c0_i32 : i32, i32, i32
  }
}

</mosaic_0001>

<bundles_post_ra>
// kernel: tpu_custom_call.1
= control target key start
LH: loop header
LB: loop body
LE: loop exit
PB: predicated region body
PF: predicated region fallthrough
CT: control target
= control target key end

     0   :  { %s1189_s0 = inlined_call_operand.hbm [shape: bf16[4,8,16], index: 0, kind: input, shape index: {}]   ;;  %s1190_s1 = inlined_call_operand.hbm [shape: bf16[4,8,16], index: 1, kind: input, shape index: {}]   ;;  %s1191_s2 = inlined_call_operand.hbm [shape: bf16[4,8,16], index: 2, kind: input, shape index: {}]   ;;  %s1192_s3 = inlined_call_operand.hbm [shape: f32[4,8,16], index: 3, kind: output, shape index: {}]  }
   0x1   :  { %1198 = sst [smem:[#allocation18_spill]] %s1190_s1 }
   0x2   :  { %8 = vsyncpa [#allocation6], 0 }
   0x3   :  { %10 = vsyncpa [#allocation6 + $0x1], 0 }
   0x4   :  { %11 = vsyncpa [#allocation9], 0 }
   0x5   :  { %13 = vsyncpa [#allocation9 + $0x1], 0 }
   0x6   :  { %14 = vsyncpa [#allocation7], 0 }
   0x7   :  { %16 = vsyncpa [#allocation7 + $0x1], 0  ;;  %s915_s12 = smov 0   ;;  %s917_s13 = smov 0  }
   0x8   :  { %s919_s14 = smov 0   ;;  %s921_s15 = smov 0  }
   0x9   :  { %s923_s16 = smov 0   ;;  %s925_s17 = smov 0  }
   0xa LB: > { %1199 = sst [smem:[#allocation15_spill]] %s881_s16  ;;  %s946_s18 = sadd.s32 4294967295, %s885_s17   ;;  %s885_s17 = sphi %s925_s17, %s22_s17   ;;  %s881_s16 = sphi %s923_s16, %s1219_s16   ;;  %s877_s15 = sphi %s921_s15, %s1218_s15   ;;  %s873_s14 = sphi %s919_s14, %s1222_s14   ;;  %s869_s13 = sphi %s917_s13, %s1221_s13   ;;  %s865_s12 = sphi %s915_s12, %s1220_s12  }
   0xb   : > { %s589_s19 = sadd.s32 4294967294, %s885_s17   ;;  %s41_s20 = sadd.s32 1, %s881_s16 }
   0xc   : > { %s50_s21 = sadd.s32 1, %s873_s14  ;;  %p43_p0 = scmp.ge.s32.totalorder %s41_s20, 4 }
   0xd   : > { %p57_p1 = scmp.ne.s32.totalorder %s873_s14, %s869_s13  ;;  %p58_p2 = scmp.eq.s32.totalorder %s885_s17, 0 }
   0xe   : > { %p63_p3 = scmp.ne.s32.totalorder %s869_s13, %s865_s12  ;;  %s1224_s20 = smov (%p43_p0, %s41_s20), 0 }
   0xf   : > { %1200 = sst [smem:[#allocation16_spill]] %s1224_s20  ;;  %p958_p4 = por %p58_p2, %p57_p1 }
  0x10   : > { %p64_p5 = scmp.eq.s32.totalorder %s946_s18, 0  ;;  %s45_s23 = ssub.s32 %s881_s16, %s1224_s20 }
  0x11   : > { %p145_p6 = scmp.eq.s32.totalorder %s946_s18, 3  ;;  %p48_p7 = scmp.eq.s32.totalorder %s45_s23, 0 }
  0x12   : > { %p966_p8 = por %p64_p5, %p63_p3  ;;  %p151_p10 = scmp.eq.s32.totalorder %s589_s19, 3 }
  0x13   : > { %p970_p9 = por %p145_p6, %p57_p1  ;;  %p647_p12 = scmp.lt.s32.totalorder %s885_s17, 4 }
  0x14   : > { %s1202_s24 = scalar_select %p966_p8, 1, 0 }
  0x15   : > { %s1203_s25 = scalar_select %p970_p9, 1, 0 }
  0x16   : > { %s975_s26 = scalar_select %p48_p7, %s873_s14, %s50_s21  }
  0x17   : > { %p977_p11 = por %p151_p10, %p63_p3  ;;  %s171_s28 = sand.u32 1, %s873_s14  }
  0x18   : > { %1204 = sst [smem:[#allocation17_spill]] %s975_s26  ;;  %s985_s29 = sshll.u32 %s171_s28, 2 }
  0x19   : > { %s1205_s27 = scalar_select %p977_p11, 1, 0 }
  0x1a   : > { %s988_s30 = sshll.u32 %s881_s16, 6  ;;  %p992_p13 = pnand %p647_p12, %p958_p4 }
  0x1b   : > { %s190_s5 = sand.u32 1, %s885_s17   ;;  %s1207_s1 = sld [smem:[#allocation18_spill]] }
  0x1c   : > { %s1206_s4 = scalar_select %p992_p13, 1, 0 }
  0x1d   : > { %s194_s9 = scalar_lea.vmem [#allocation8], %s985_s29  ;;  %s1008_s11 = scalar_lea.sflag [#allocation9], %s190_s5 }
  0x1e   : > { %s202_s10 = sshll.u32 %s194_s9, 4  ;;  %p1014_p3 = pneg %p992_p13  ;;  %s1005_s10 = int_to_ptr.vmem [resolvable:$true] %s202_s10 }
  0x21   : > { %s1001_s8 = scalar_lea.hbm %s1207_s1, %s988_s30  ;;  %s714_s6 = scalar_lea.hbm %s1207_s1, 256 }
  0x22   : > { %s709_s19 = scalar_lea.hbm %s1001_s8, 64  ;;  %p715_p6 = scmp.lt.u32.totalorder %s1001_s8, %s1207_s1 }
  0x23   : > { %p710_p2 = scmp.ne.s32.totalorder %s1001_s8, %s709_s19  ;;  %p716_p7 = scmp.lt.u32.totalorder %s714_s6, %s709_s19 }
  0x24   : > { %p718_p12 = scmp.lt.u32.totalorder %s709_s19, %s1001_s8 }
  0x25   : > { %p712_p4 = pnand %p1014_p3, %p710_p2  ;;  %p717_p10 = por %p716_p7, %p715_p6 }
  0x27   : > { %p713_p5 = pneg %p712_p4  ;;  %p719_p0 = por %p718_p12, %p717_p10 }
  0x29   : > { %p720_p1 = pnand %p719_p0, %p713_p5 }
  0x2b   : > { %723 = shalt.err (!%p720_p1)
}
  0x2c   : > { %s724_s5 = scalar_lea.vmem %s1005_s10, 64  ;;  %s887_s22 = smov [#allocation8]  }
  0x2d   : > { %p725_p2 = scmp.ne.s32.totalorder %s1005_s10, %s724_s5  ;;  %s729_s23 = sshll.u32 %s887_s22, 4  ;;  %s730_s23 = int_to_ptr.vmem [resolvable:$false] %s729_s23 }
  0x2e   : > { %s731_s7 = scalar_lea.vmem %s730_s23, 128  ;;  %p732_p9 = scmp.lt.s32.totalorder %s1005_s10, %s730_s23 }
  0x2f   : > { %p727_p4 = pnand %p725_p2, %p1014_p3  ;;  %p733_p8 = scmp.lt.s32.totalorder %s731_s7, %s724_s5 }
  0x31   : > { %p728_p11 = pneg %p727_p4  ;;  %p734_p6 = por %p733_p8, %p732_p9 }
  0x33   : > { %p735_p7 = pnand %p734_p6, %p728_p11 }
  0x35   : > { %738 = shalt.err (!%p735_p7)
}
  0x36   : > { %639 = dma.hbm_to_vmem [thread:$0]  (!%p992_p13), %s1001_s8, 64, %s1005_s10, %s1008_s11  }
  0x37   : > { %p1209_p0 = scmp.lt.s32.totalorder %s885_s17, 5  ;;  %p1210_p1 = scmp.ge.s32.totalorder %s885_s17, 1 }
  0x38   : > { %s1050_s5 = scalar_lea.hbm %s1189_s0, %s988_s30  ;;  %s175_s22 = scalar_lea.vmem [#allocation5], %s985_s29 }
  0x39   : > { %p1042_p5 = pnand %p1210_p1, %p1209_p0  ;;  %s183_s23 = sshll.u32 %s175_s22, 4  ;;  %s1053_s23 = int_to_ptr.vmem [resolvable:$true] %s183_s23 }
  0x3a   : > { %s1059_s7 = scalar_lea.hbm %s1191_s2, %s988_s30  ;;  %s172_s1 = scalar_lea.sflag [#allocation6], %s171_s28 }
  0x3b   : > { %s1211_s19 = scalar_select %p1042_p5, 1, 0 }
  0x3c   : > { %s739_s20 = scalar_lea.hbm %s1050_s5, 64  ;;  %s744_s16 = scalar_lea.hbm %s1189_s0, 256 }
  0x3d   : > { %p740_p8 = scmp.ne.s32.totalorder %s1050_s5, %s739_s20  ;;  %p745_p10 = scmp.lt.u32.totalorder %s1050_s5, %s1189_s0 }
  0x3e   : > { %p746_p12 = scmp.lt.u32.totalorder %s744_s16, %s739_s20  ;;  %p748_p4 = scmp.lt.u32.totalorder %s739_s20, %s1050_s5 }
  0x3f   : > { %p742_p9 = pnand %p740_p8, %p1014_p3 }
  0x40   : > { %p747_p2 = por %p746_p12, %p745_p10 }
  0x41   : > { %p743_p11 = pneg %p742_p9 }
  0x42   : > { %p749_p6 = por %p748_p4, %p747_p2 }
  0x44   : > { %p750_p7 = pnand %p749_p6, %p743_p11 }
  0x46   : > { %753 = shalt.err (!%p750_p7)
}
  0x47   : > { %s754_s28 = scalar_lea.vmem %s1053_s23, 64  ;;  %s888_s30 = smov [#allocation5]  }
  0x48   : > { %p755_p0 = scmp.ne.s32.totalorder %s1053_s23, %s754_s28  ;;  %s759_s8 = sshll.u32 %s888_s30, 4  ;;  %s760_s8 = int_to_ptr.vmem [resolvable:$false] %s759_s8 }
  0x49   : > { %s761_s26 = scalar_lea.vmem %s760_s8, 128  ;;  %p762_p9 = scmp.lt.s32.totalorder %s1053_s23, %s760_s8 }
  0x4a   : > { %p757_p1 = pnand %p755_p0, %p1014_p3  ;;  %p763_p5 = scmp.lt.s32.totalorder %s761_s26, %s754_s28 }
  0x4c   : > { %p758_p8 = pneg %p757_p1  ;;  %p764_p10 = por %p763_p5, %p762_p9 }
  0x4e   : > { %p765_p12 = pnand %p764_p10, %p758_p8 }
  0x50   : > { %768 = shalt.err (!%p765_p12)
}
  0x51   : > { %636 = dma.hbm_to_vmem [thread:$0]  (!%p992_p13), %s1050_s5, 64, %s1053_s23, %s172_s1  }
  0x52   : > { %s213_s16 = scalar_lea.vmem [#allocation10], %s985_s29  ;;  %s769_s10 = scalar_lea.hbm %s1059_s7, 64 }
  0x53   : > { %s221_s20 = sshll.u32 %s213_s16, 4  ;;  %p770_p11 = scmp.ne.s32.totalorder %s1059_s7, %s769_s10  ;;  %s222_s20 = int_to_ptr.vmem [resolvable:$true] %s221_s20 }
  0x54   : > { %s774_s22 = scalar_lea.hbm %s1191_s2, 256  ;;  %p775_p4 = scmp.lt.u32.totalorder %s1059_s7, %s1191_s2 }
  0x55   : > { %p772_p5 = pnand %p770_p11, %p1014_p3  ;;  %p776_p6 = scmp.lt.u32.totalorder %s774_s22, %s769_s10 }
  0x56   : > { %p778_p0 = scmp.lt.u32.totalorder %s769_s10, %s1059_s7 }
  0x57   : > { %p773_p2 = pneg %p772_p5  ;;  %p777_p7 = por %p776_p6, %p775_p4 }
  0x59   : > { %p779_p1 = por %p778_p0, %p777_p7 }
  0x5b   : > { %p780_p8 = pnand %p779_p1, %p773_p2 }
  0x5d   : > { %783 = shalt.err (!%p780_p8)
}
  0x5e   : > { %s784_s1 = scalar_lea.vmem %s222_s20, 64  ;;  %s889_s29 = smov [#allocation10]  }
  0x5f   : > { %p785_p9 = scmp.ne.s32.totalorder %s222_s20, %s784_s1  ;;  %s789_s5 = sshll.u32 %s889_s29, 4  ;;  %s790_s5 = int_to_ptr.vmem [resolvable:$false] %s789_s5 }
  0x60   : > { %s791_s23 = scalar_lea.vmem %s790_s5, 128  ;;  %p792_p11 = scmp.lt.s32.totalorder %s222_s20, %s790_s5 }
  0x61   : > { %p787_p10 = pnand %p785_p9, %p1014_p3  ;;  %p793_p5 = scmp.lt.s32.totalorder %s791_s23, %s784_s1 }
  0x63   : > { %p788_p12 = pneg %p787_p10  ;;  %p794_p13 = por %p793_p5, %p792_p11 }
  0x65   : > { %p795_p4 = pnand %p794_p13, %p788_p12 }
  0x67   : > { %798 = shalt.err (!%p795_p4)
}
  0x68   : > { %p1212_p6 = scmp.ne.s32.totalorder %s1206_s4, 0  ;;  %p1213_p2 = scmp.ne.s32.totalorder %s1211_s19, 0 }
  0x69   : > { %s1106_s21 = sand.u32 (!%p1213_p2), 1, %s869_s13   ;;  %p1214_p13 = scmp.ne.s32.totalorder (!%p1213_p2), %s1202_s24, 0 }
  0x6a   : > { %642 = dma.hbm_to_vmem [thread:$0]  (!%p1212_p6), %s1059_s7, 64, %s222_s20, %s1008_s11  }
  0x6b   : > { %230 = sbr.rel (%p1213_p2) target bundleno = 936 (0x3a8), region = 32  ;;  %s1109_s8 = sshll.u32 (!%p1213_p2), %s1106_s21, 2 }
  0x6c   : > { %s233_s26 = scalar_lea.sflag (!%p1213_p2), [#allocation6], %s1106_s21  ;;  %s236_s16 = scalar_lea.vmem (!%p1213_p2), [#allocation5], %s1109_s8 }
  0x72   : > { %852 = dma.done.wait (%p1214_p13), %s233_s26, 64  }
  0x73   : > { %854 = vsyncadd (%p1214_p13), %s233_s26, 4294967232  ;;  %s241_s4 = sand.u32 1, %s946_s18   ;;  %s245_s19 = scalar_lea.vmem [#allocation8], %s1109_s8 }
  0x74   : > { %s242_s11 = scalar_lea.sflag [#allocation9], %s241_s4 }
  0x75   : > { %856 = dma.done.wait (%p1214_p13), %s242_s11, 128  }
  0x76   : > { %858 = vsyncadd (%p1214_p13), %s242_s11, 4294967168  ;;  %vm296_vm0 = vcmask 130048   ;;  %v890_v0 = vmov 0.0   ;;  %vm891_vm1 = vmmov 0   ;;  %v300_v1 = vld [vmem:[%s245_s19] sm:$0xf] }
  0x77   : > { %613 = vmatprep.subr.bf16.mxu0 %v890_v0  ;;  %297 = vst.msk [vmem:[#allocation4] sm:$0xff] %vm296_vm0, %v890_v0  ;;  %615 = vmatprep.mubr.msk.bf16.mxu0 %vm891_vm1, %v890_v0  ;;  %v306_v2 = vsel %vm296_vm0, %v300_v1, 0  ;;  %v298_v3 = vld [vmem:[%s236_s16] sm:$0xf]  ;;  %vm293_vm2 = vcmask 7168   ;;  %v892_v5 = vmov -inf  }
  0x78   : > { %619 = vmatprep.subr.bf16.mxu1 %v890_v0  ;;  %621 = vmatprep.mubr.msk.bf16.mxu1 %vm891_vm1, %v890_v0  ;;  %v299_v4 = vmul.bf16 1050820258, %v298_v3  ;;  %294 = vst.msk [vmem:[#allocation2] sm:$0xff] %vm293_vm2, %v892_v5  ;;  %295 = vst.msk [vmem:[#allocation3] sm:$0xff] %vm293_vm2, %v890_v0  ;;  %vm349_vm3 = vcmask 64512   ;;  %v893_v11 = vmov 0  }
  0x79   : > { %614 = vmatpush3.bf16.xpose.msra.mxu0 %v306_v2  ;;  %701 = vset.pattern.permute.xlu0 %v893_v11  ;;  %vm385_vm4 = vcmask 1043456   ;;  %s254_s18 = scalar_lea.vmem [#allocation10], %s1109_s8  ;;  %s602_s24 = sshll.u32 %s1106_s21, 3 }
  0x7a   : > { %702 = vset.pattern.permute.xlu1 %v893_v11  ;;  %v381_v16 = vld [vmem:[%s254_s18] sm:$0xf]  ;;  %s606_s7 = sshll.u32 %s877_s15, 7  ;;  %s286_s20 = scalar_lea.vmem [#allocation11], %s602_s24 }
  0x7b   : > { %v387_v17 = vsel %vm385_vm4, %v381_v16, 0  ;;  %s460_s10 = sshll.u32 %s286_s20, 4  ;;  %s1140_s22 = scalar_lea.hbm %s1192_s3, %s606_s7  ;;  %s1142_s10 = int_to_ptr.vmem [resolvable:$true] %s460_s10 }
  0x7c   : > { %620 = vmatpush3.bf16.msra.mxu1 %v387_v17  ;;  %s446_s28 = scalar_lea.sflag [#allocation7], %s1106_s21  ;;  %s799_s30 = scalar_lea.vmem %s1142_s10, 128 }
  0x7d   : > { %p800_p3 = scmp.ne.s32.totalorder %s1142_s10, %s799_s30  ;;  %p1215_p7 = scmp.ne.s32.totalorder %s1203_s25, 0 }
  0x7e   : > { %v373_v32 = vld [vmem:[#allocation4] sm:$0xff]  ;;  %s894_s15 = smov [#allocation11]  }
  0x7f   : > { %v348_v12 = vld [vmem:[#allocation2] sm:$0xff]  ;;  %v365_v26 = vld [vmem:[#allocation3] sm:$0xff]  ;;  %p801_p0 = pnand %p800_p3, %p1215_p7  ;;  %s803_s1 = sshll.u32 %s894_s15, 4  ;;  %s804_s1 = int_to_ptr.vmem [resolvable:$false] %s803_s1 }
  0x80   : > { %616 = vmatmul.mubr.msk.bf16.vlgmr.msra.gmra.mrb[0].mxu0 %vm296_vm0, %v299_v4  ;;  %s805_s29 = scalar_lea.vmem %s804_s1, 256  ;;  %p806_p8 = scmp.lt.s32.totalorder %s1142_s10, %s804_s1 }
  0x81   : > { %p802_p1 = pneg %p801_p0  ;;  %p807_p9 = scmp.lt.s32.totalorder %s805_s29, %s799_s30 }
  0x83   : > { %p808_p10 = por %p807_p9, %p806_p8 }
  0x85   : > { %p809_p12 = pnand %p808_p10, %p802_p1 }
 0x153   : > { %v342_v6 = vpop.f32.mrb[0].mxu0 }
 0x154   : > { %v617_v7 = vpop.f32.mrb[1].mxu0  ;;  %v350_v8 = vsel %vm349_vm3, %v342_v6, -inf }
 0x155   : > { %351 = vmax.xlane.f32.xlu0 %v350_v8  ;;  %v345_v9 = vpop.f32.mrb[2].mxu0 }
 0x156   : > { %v618_v10 = vpop.f32.mrb[3].mxu0 }
 0x1e2   : > { %v352_v13 = vpop.xlane.xlu0 %351 }
 0x1e3   : > { %v353_v14 = vmax.f32 %v348_v12, %v352_v13 }
 0x1e5   : > { %v354_v15 = vsub.f32 %v348_v12, %v353_v14  ;;  %431 = vst.msk [vmem:[#allocation2] sm:$0xff] %vm293_vm2, %v353_v14  ;;  %359 = vperm.xlu0 %701, %v353_v14  }
 0x1e7   : > { %v355_v24 = vmul.f32 1.442695, %v354_v15 }
 0x264   : > { %v360_v18 = vpop.permute.xlu0 %359 }
 0x265   : > { %v362_v19 = vsub.f32 %v342_v6, %v360_v18 }
 0x267   : > { %v363_v20 = vmul.f32 1.442695, %v362_v19 }
 0x269   : > { %703 = vpow2.f32 %v363_v20 }
 0x26a   : > { %705 = vpow2.f32 %v355_v24 }
 0x273   : > { %v704_v21 = vpop.eup %703 }
 0x274   : > { %v367_v22 = vsel %vm349_vm3, %v704_v21, 0.0  ;;  %v380_v23 = vpack.c.bf16 %v704_v21, %v704_v21  ;;  %v706_v25 = vpop.eup %705 }
 0x275   : > { %368 = vadd.xlane.f32.xlu1 %v367_v22  ;;  %v366_v27 = vmul.f32 %v706_v25, %v365_v26 }
 0x276   : > { %622 = vmatmul.mubr.msk.bf16.vlgmr.msra.gmra.mrb[0].mxu1 %vm349_vm3, %v380_v23 }
 0x286   : > { %376 = vperm.xlu1 %702, %v706_v25  }
 0x302   : > { %v369_v28 = vpop.xlane.xlu1 %368 }
 0x303   : > { %v370_v29 = vadd.f32 %v369_v28, %v366_v27 }
 0x305   : > { %372 = vst.msk [vmem:[#allocation3] sm:$0xff] %vm293_vm2, %v370_v29 }
 0x306   : > { %v377_v33 = vpop.permute.xlu1 %376 }
 0x307   : > { %v379_v34 = vmul.f32 %v377_v33, %v373_v32 }
 0x30c   : > { %v435_v30 = vld [vmem:[#allocation3] sm:$0xff] }
 0x30d   : > { %707 = vrcp.f32 %v435_v30 }
 0x317   : > { %v708_v31 = vpop.eup %707 }
 0x318   : > { %440 = vperm.xlu1 %702, %v708_v31  }
 0x349   : > { %v423_v35 = vpop.f32.mrb[0].mxu1 }
 0x34a   : > { %v429_v36 = vadd.f32 %v423_v35, %v379_v34  ;;  %v623_v37 = vpop.f32.mrb[1].mxu1 }
 0x34b   : > { %v426_v38 = vpop.f32.mrb[2].mxu1 }
 0x34c   : > { %430 = vst.msk [vmem:[#allocation4] sm:$0xff] %vm296_vm0, %v429_v36  ;;  %v624_v39 = vpop.f32.mrb[3].mxu1 }
 0x353   : > { %v437_v40 = vld [vmem:[#allocation4] sm:$0xff] }
 0x397   : > { %v441_v41 = vpop.permute.xlu1 %440 }
 0x398   : > { %v443_v42 = vmul.f32 %v441_v41, %v437_v40 }
 0x39a   : > { %444 = vst.msk [vmem:[%s286_s20] sm:$0xff] %vm296_vm0, %v443_v42 }
 0x39b   : > { %812 = shalt.err (!%p809_p12)
}
 0x39c   : > { %s813_s5 = scalar_lea.hbm %s1140_s22, 128  ;;  %s817_s8 = scalar_lea.hbm %s1192_s3, 512 }
 0x39d   : > { %p814_p11 = scmp.ne.s32.totalorder %s1140_s22, %s813_s5  ;;  %p818_p6 = scmp.lt.u32.totalorder %s1140_s22, %s1192_s3 }
 0x39e   : > { %p819_p2 = scmp.lt.u32.totalorder %s817_s8, %s813_s5  ;;  %p821_p3 = scmp.lt.u32.totalorder %s813_s5, %s1140_s22 }
 0x39f   : > { %p815_p5 = pnand %p814_p11, %p1215_p7 }
 0x3a0   : > { %p820_p13 = por %p819_p2, %p818_p6 }
 0x3a1   : > { %p816_p4 = pneg %p815_p5 }
 0x3a2   : > { %p822_p0 = por %p821_p3, %p820_p13 }
 0x3a4   : > { %p823_p1 = pnand %p822_p0, %p816_p4 }
 0x3a6   : > { %826 = shalt.err (!%p823_p1)
}
 0x3a7   : > { %631 = dma.vmem_to_hbm [thread:$0]  (%p1215_p7), %s1142_s10, 128, %s1140_s22, %s446_s28  }
 0x3a8 PF: > { %p648_p8 = scmp.ge.s32.totalorder %s885_s17, 2  ;;  %s472_s4 = sand.u32 1, %s865_s12  }
 0x3a9   : > { %p1216_p9 = scmp.ne.s32.totalorder %s1205_s27, 0  ;;  %s473_s11 = scalar_lea.sflag [#allocation7], %s472_s4 }
 0x3ab   : > { %p644_p10 = pnand %p648_p8, %p1216_p9 }
 0x3ad   : > { %860 = dma.done.wait (!%p644_p10), %s473_s11, 128  }
 0x3ae   : > { %862 = vsyncadd (!%p644_p10), %s473_s11, 4294967168  ;;  %s22_s17 = sadd.s32 1, %s885_s17   ;;  %s1217_s25 = sld [smem:[#allocation17_spill]] }
 0x3af   : > { %p19_p12 = scmp.ge.s32.totalorder %s22_s17, 6   ;;  %s1218_s15 = sld [smem:[#allocation15_spill]] }
 0x3b0   : > { %s1219_s16 = sld [smem:[#allocation16_spill]]  ;;  %s1220_s12 = smov %s869_s13 }
 0x3b1   : > { %s1221_s13 = smov %s873_s14  ;;  %21 = sbr.rel (!%p19_p12) target bundleno = 10 (0xa), region = 109 }
 0x3b4   : > { %s1222_s14 = smov %s1217_s25 }
 0x3b8   :  { %478 = vsyncpa [#allocation6], 1 }
 0x3b9   :  { %480 = vsyncpa [#allocation6 + $0x1], 1 }
 0x3ba   :  { %481 = vsyncpa [#allocation9], 1 }
 0x3bb   :  { %483 = vsyncpa [#allocation9 + $0x1], 1 }
 0x3bc   :  { %484 = vsyncpa [#allocation7], 1 }
 0x3bd   :  { %486 = vsyncpa [#allocation7 + $0x1], 1 }

</bundles_post_ra>
